<compile_context>
chip_gen: v7x
topology: tpu7x:2x2x1
jax: 0.10.0
libtpu: 0.0.40
codegen_flags: <defaults>
</compile_context>

<pallas_src>
import random

import jax
import jax.numpy as jnp
from jax.experimental import pallas as pl
from jax.experimental.pallas import tpu as pltpu


def _batch_drop_kernel(x_ref, mask_ref, o_ref):
    # x_ref: (TILE_ROWS, H*W); mask_ref: (1, H*W), VMEM-resident across the grid.
    # Single broadcast multiply -> purely HBM-bandwidth bound.
    o_ref[...] = x_ref[...] * mask_ref[...]


def _pick_tile_rows(nc, row_bytes, target_tile_bytes=2 * 1024 * 1024):
    """Row-tile that is a multiple of 8 (sublane), ~target_tile_bytes big,
    and leaves >= 2 grid steps when possible (feeds both v7x TensorCores)."""
    tile_rows = max(8, (target_tile_bytes // max(row_bytes, 1)) // 8 * 8)
    if tile_rows >= nc:
        if nc >= 16:
            tile_rows = max(8, (nc // 2) // 8 * 8)  # at least 2 grid steps
        else:
            tile_rows = nc  # single block; block dim == full array dim is legal
    return int(tile_rows)


def batch_drop(x, h_ratio, w_ratio, *, training=True, rng=None):
    """JAX/Pallas equivalent of BatchDrop.forward.

    x: (N, C, H, W) array. Returns an array of the same shape/dtype.
    The random rectangle is shared across the whole batch and all channels,
    exactly as in the PyTorch reference.
    """
    if not training:
        return x

    n, c, h, w = x.shape
    rh = int(round(h_ratio * h))
    rw = int(round(w_ratio * w))

    if rng is None:
        rng = random  # module-level RNG, matching the PyTorch module
    sx = rng.randint(0, h - rh)
    sy = rng.randint(0, w - rw)

    # Empty rectangle -> all-ones mask -> identity. Skip the HBM round trip
    # (still consumes the RNG draws above, matching PyTorch call order).
    if rh == 0 or rw == 0:
        return x

    nc = n * c
    hw = h * w

    # Tiny rectangle mask, flattened to one lane-dense row (1, H*W). Built
    # eagerly (outside the kernel); passed as data, so the Pallas kernel's
    # compile cache is keyed only on shapes/dtypes, not on the rectangle.
    rows = jnp.arange(h, dtype=jnp.int32)[:, None]
    cols = jnp.arange(w, dtype=jnp.int32)[None, :]
    inside = (rows >= sx) & (rows < sx + rh) & (cols >= sy) & (cols < sy + rw)
    mask = jnp.where(inside, 0, 1).astype(x.dtype).reshape(1, hw)

    x_flat = x.reshape(nc, hw)  # row-major contiguous: free metadata reshape

    row_bytes = hw * jnp.dtype(x.dtype).itemsize
    tile_rows = _pick_tile_rows(nc, row_bytes)
    grid = (pl.cdiv(nc, tile_rows),)

    out_flat = pl.pallas_call(
        _batch_drop_kernel,
        out_shape=jax.ShapeDtypeStruct((nc, hw), x.dtype),
        grid=grid,
        in_specs=[
            pl.BlockSpec((tile_rows, hw), lambda i: (i, 0)),  # x rows
            pl.BlockSpec((1, hw), lambda i: (0, 0)),          # resident mask
        ],
        out_specs=pl.BlockSpec((tile_rows, hw), lambda i: (i, 0)),
        compiler_params=pltpu.CompilerParams(
            dimension_semantics=("parallel",),
        ),
    )(x_flat, mask)

    return out_flat.reshape(n, c, h, w)


if __name__ == "__main__":
    # Deterministic example inputs (NCHW), small shapes.
    key = jax.random.PRNGKey(0)
    N, C, H, W = 2, 4, 16, 16
    x = jax.random.normal(key, (N, C, H, W), dtype=jnp.float32)

    h_ratio, w_ratio = 0.3, 0.3
    rng = random.Random(0)  # deterministic stand-in for python `random`

    out = batch_drop(x, h_ratio, w_ratio, training=True, rng=rng)
    out = jax.block_until_ready(out)

    # Reference check in plain JAX (same rectangle coordinates).
    rh = int(round(h_ratio * H))
    rw = int(round(w_ratio * W))
    rng_ref = random.Random(0)
    sx = rng_ref.randint(0, H - rh)
    sy = rng_ref.randint(0, W - rw)
    ref_mask = jnp.ones((N, C, H, W), dtype=x.dtype)
    ref_mask = ref_mask.at[:, :, sx:sx + rh, sy:sy + rw].set(0.0)
    ref = x * ref_mask

    assert out.shape == x.shape and out.dtype == x.dtype
    assert jnp.allclose(out, ref), "mismatch vs reference"

    # Eval-mode path is identity.
    out_eval = batch_drop(x, h_ratio, w_ratio, training=False)
    assert jnp.array_equal(out_eval, x)

    # Degenerate-rectangle fast path (ratio 0 -> rh == 0) is identity.
    out_zero = batch_drop(x, 0.0, 0.0, training=True, rng=random.Random(1))
    assert jnp.array_equal(out_zero, x)

    print("KERNEL_OK")
</pallas_src>

<mosaic_0001>
module attributes {stable_mosaic.version = 11 : i64} {
  func.func @_batch_drop_kernel(%arg0: i32, %arg1: memref<8x256xf32, #tpu.memory_space<vmem>>, %arg2: memref<1x256xf32, #tpu.memory_space<vmem>>, %arg3: memref<8x256xf32, #tpu.memory_space<vmem>>) attributes {dimension_semantics = [#tpu.dimension_semantics<parallel>], iteration_bounds = array<i64: 1>, scalar_prefetch = 0 : i64, scratch_operands = 0 : i64, tpu.core_type = #tpu.core_type<tc>, window_params = [{transform_indices = @transform_0, window_bounds = array<i64: 8, 256>}, {pipeline_mode = #tpu.pipeline_mode<synchronous>, transform_indices = @transform_1, window_bounds = array<i64: 1, 256>}, {transform_indices = @transform_2, window_bounds = array<i64: 8, 256>}]} {
    %c0 = arith.constant 0 : index
    %c0_0 = arith.constant 0 : index
    %0 = vector.load %arg1[%c0, %c0_0] : memref<8x256xf32, #tpu.memory_space<vmem>>, vector<8x256xf32>
    %c0_1 = arith.constant 0 : index
    %c0_2 = arith.constant 0 : index
    %1 = vector.load %arg2[%c0_1, %c0_2] : memref<1x256xf32, #tpu.memory_space<vmem>>, vector<1x256xf32>
    %2 = vector.broadcast %1 : vector<1x256xf32> to vector<8x256xf32>
    %3 = arith.mulf %0, %2 : vector<8x256xf32>
    %c0_3 = arith.constant 0 : index
    %c0_4 = arith.constant 0 : index
    %4 = vector.load %arg3[%c0_3, %c0_4] : memref<8x256xf32, #tpu.memory_space<vmem>>, vector<8x256xf32>
    tpu.vector_store %arg3[%c0_3, %c0_4], %3 {strides = array<i32>} : memref<8x256xf32, #tpu.memory_space<vmem>>, vector<8x256xf32>,
    return
  }
  func.func @transform_0(%arg0: i32) -> (i32, i32) {
    %c0_i32 = arith.constant 0 : i32
    %c0_i32_0 = arith.constant 0 : i32
    return %arg0, %c0_i32 : i32, i32
  }
  func.func @transform_1(%arg0: i32) -> (i32, i32) {
    %c0_i32 = arith.constant 0 : i32
    %c0_i32_0 = arith.constant 0 : i32
    %c0_i32_1 = arith.constant 0 : i32
    return %c0_i32, %c0_i32_0 : i32, i32
  }
  func.func @transform_2(%arg0: i32) -> (i32, i32) {
    %c0_i32 = arith.constant 0 : i32
    %c0_i32_0 = arith.constant 0 : i32
    return %arg0, %c0_i32 : i32, i32
  }
}

</mosaic_0001>

<bundles_post_ra>
// kernel: tpu_custom_call.1
= control target key start
LH: loop header
LB: loop body
LE: loop exit
PB: predicated region body
PF: predicated region fallthrough
CT: control target
= control target key end

     0   :  { %7 = vsyncpa [#allocation3], 0  ;;  %s151_s0 = inlined_call_operand.hbm [shape: f32[8,256], index: 0, kind: input, shape index: {}]   ;;  %s152_s1 = inlined_call_operand.vmem [shape: f32[1,256], index: 1, kind: input, shape index: {}]   ;;  %s153_s2 = inlined_call_operand.hbm [shape: f32[8,256], index: 2, kind: output, shape index: {}]  }
   0x1   :  { %8 = vsyncpa [#allocation4], 0  ;;  %s107_s9 = smov [#allocation2]   ;;  %s59_s13 = scalar_lea.hbm %s151_s0, 256 }
   0x2   :  { %s15_s10 = sshll.u32 %s107_s9, 4  ;;  %p60_p0 = scmp.ne.s32.totalorder %s151_s0, %s59_s13  ;;  %s16_s10 = int_to_ptr.vmem [resolvable:$true] %s15_s10 }
   0x3   :  { %p63_p1 = scmp.lt.u32.totalorder %s59_s13, %s151_s0 }
   0x5   :  { %p65_p2 = pnand %p63_p1, %p60_p0 }
   0x7   :  { %68 = shalt.err (!%p65_p2)
}
   0x8   :  { %s69_s18 = scalar_lea.vmem %s16_s10, 256  ;;  %p74_p4 = scmp.lt.s32.totalorder %s16_s10, %s16_s10 }
   0x9   :  { %p70_p3 = scmp.ne.s32.totalorder %s16_s10, %s69_s18  ;;  %p75_p5 = scmp.lt.s32.totalorder %s69_s18, %s69_s18 }
   0xb   :  { %p76_p6 = por %p75_p5, %p74_p4 }
   0xd   :  { %p77_p7 = pnand %p76_p6, %p70_p3 }
   0xf   :  { %80 = shalt.err (!%p77_p7)
}
  0x10   :  { %18 = dma.hbm_to_vmem [thread:$0]  %s151_s0, 256, %s16_s10, [#allocation3]  }
  0x11   :  { %103 = dma.done.wait [#allocation3], 256  }
  0x12   :  { %104 = vsyncadd [#allocation3], 4294967040  ;;  %v28_v0 = vlaneseq  ;;  %v24_v4 = vld [vmem:[#allocation2] sm:$0xff]  ;;  %v25_v6 = vld [vmem:[#allocation2 + $0x8] sm:$0xff]  ;;  %s108_s23 = smov [#allocation5]  }
  0x13   :  { %v26_v5 = vld [vmem:[%s152_s1] sm:$0x3]  ;;  %s48_s24 = sshll.u32 %s108_s23, 4  ;;  %s49_s24 = int_to_ptr.vmem [resolvable:$true] %s48_s24 }
  0x14   :  { %v29_v1 = vshrl.u32 %v28_v0, 7  ;;  %s81_s0 = scalar_lea.vmem %s49_s24, 256  ;;  %p86_p9 = scmp.lt.s32.totalorder %s49_s24, %s49_s24 }
  0x15   :  { %p82_p8 = scmp.ne.s32.totalorder %s49_s24, %s81_s0  ;;  %p87_p10 = scmp.lt.s32.totalorder %s81_s0, %s81_s0 }
  0x16   :  { %v30_v2 = vsub.s32 0, %v29_v1  ;;  %v34_v3 = vsub.s32 1, %v29_v1 }
  0x17   :  { %p88_p11 = por %p87_p10, %p86_p9 }
  0x18   :  { %v31_v7 = vrot.slane %v26_v5, %v30_v2  ;;  %v35_v8 = vrot.slane %v26_v5, %v34_v3 }
  0x19   :  { %p89_p12 = pnand %p88_p11, %p82_p8 }
  0x1a   :  { %v38_v9 = vmul.f32 %v31_v7, %v24_v4  ;;  %v39_v10 = vmul.f32 %v35_v8, %v25_v6 }
  0x1c   :  { %40 = vst [vmem:[#allocation5] sm:$0xff] %v38_v9  ;;  %41 = vst [vmem:[#allocation5 + $0x8] sm:$0xff] %v39_v10 }
  0x1d   :  { %92 = shalt.err (!%p89_p12)
}
  0x1e   :  { %s93_s1 = scalar_lea.hbm %s153_s2, 256 }
  0x1f   :  { %p94_p13 = scmp.ne.s32.totalorder %s153_s2, %s93_s1  ;;  %p97_p0 = scmp.lt.u32.totalorder %s93_s1, %s153_s2 }
  0x21   :  { %p99_p1 = pnand %p97_p0, %p94_p13 }
  0x23   :  { %102 = shalt.err (!%p99_p1)
}
  0x24   :  { %51 = dma.vmem_to_hbm [thread:$0]  %s49_s24, 256, %s153_s2, [#allocation4]  }
  0x25   :  { %105 = dma.done.wait [#allocation4], 256  }
  0x26   :  { %106 = vsyncadd [#allocation4], 4294967040 }
  0x27   :  { %55 = vsyncpa [#allocation3], 1 }
  0x28   :  { %56 = vsyncpa [#allocation4], 1 }

</bundles_post_ra>
